<compile_context>
chip_gen: v7x
topology: tpu7x:2x2x1
jax: 0.10.0
libtpu: 0.0.40
codegen_flags: <defaults>
</compile_context>

<pallas_src>
import jax
import jax.numpy as jnp
from jax.experimental import pallas as pl
from jax.experimental.pallas import tpu as pltpu


def _inner_product_decoder_kernel(zi_ref, zjT_ref, adj_ref):
    # zi_ref : (TM, D)  row tile of z
    # zjT_ref: (D, TN)  lane-dense column tile of z.T
    # adj_ref: (TM, TN) output tile of sigmoid(z @ z.T)
    logits = jnp.dot(
        zi_ref[...], zjT_ref[...], preferred_element_type=jnp.float32
    )
    # sigmoid(x) == 0.5 * (tanh(x / 2) + 1): a single EUP transcendental.
    adj_ref[...] = (0.5 * (jnp.tanh(0.5 * logits) + 1.0)).astype(adj_ref.dtype)


def _pick_tiles(n, max_tm, max_tn):
    """Output tile sizes (multiples of 128 where possible; cdiv-masked edges)."""
    if n <= 128:
        # Single full-extent block on both axes is always a legal block shape.
        return n, n

    def r128(x):
        return max(128, (x // 128) * 128)

    tm = min(max_tm, r128(n))
    tn = min(max_tn, r128(n))
    # Keep >= 2 row bands so both v7x TensorCores get work on the parallel axis.
    if pl.cdiv(n, tm) < 2:
        tm = r128(pl.cdiv(n, 2))
    return tm, tn


def inner_product_decoder(z, *, max_tm=512, max_tn=1024):
    """adj = sigmoid(z @ z.T) -- matches torch.sigmoid(torch.mm(z, z.t()))."""
    N, D = z.shape
    tm, tn = _pick_tiles(N, max_tm, max_tn)
    grid = (pl.cdiv(N, tm), pl.cdiv(N, tn))

    # Lane-dense transposed operand: (D, N). Tiny HBM pass; huge layout win.
    zT = z.T

    # VMEM budget: double-buffered zi, z.T and output tiles (layout-padded),
    # with 2x headroom; capped at 64 MiB so it also fits v7x physical VMEM.
    def _lane(x):
        return ((x + 127) // 128) * 128

    def _sub(x):
        return ((x + 7) // 8) * 8

    need = 2 * 4 * (
        _sub(tm) * _lane(D)      # zi tiles
        + _sub(D) * _lane(tn)    # z.T tiles
        + _sub(tm) * _lane(tn)   # output tiles
    )
    vmem_limit = int(min(max(2 * need, 16 * 2**20), 64 * 2**20))

    cost = pl.CostEstimate(
        flops=2 * N * N * D,
        bytes_accessed=4 * N * N + 8 * N * D,
        transcendentals=N * N,
    )

    return pl.pallas_call(
        _inner_product_decoder_kernel,
        out_shape=jax.ShapeDtypeStruct((N, N), z.dtype),
        grid=grid,
        in_specs=[
            # Row tile i of z (contraction dim D is small -> no K tiling).
            pl.BlockSpec((tm, D), lambda i, j: (i, 0)),
            # Column tile j of z.T (lane-dense; MXU-native KN operand).
            pl.BlockSpec((D, tn), lambda i, j: (0, j)),
        ],
        out_specs=pl.BlockSpec((tm, tn), lambda i, j: (i, j)),
        compiler_params=pltpu.CompilerParams(
            dimension_semantics=("parallel", "parallel"),
            vmem_limit_bytes=vmem_limit,
        ),
        cost_estimate=cost,
    )(z, zT)


if __name__ == "__main__":
    # InnerProductDecoder has no parameters; only the latent input z.
    key = jax.random.PRNGKey(0)
    N, D = 256, 32  # small synthetic latent matrix
    z = jax.random.normal(key, (N, D), dtype=jnp.float32)

    adj = inner_product_decoder(z)
    adj = jax.block_until_ready(adj)

    # Sanity check against a plain JAX reference.
    ref = jax.nn.sigmoid(z @ z.T)
    assert adj.shape == (N, N)
    assert jnp.allclose(adj, ref, atol=1e-5, rtol=1e-5)

    print("KERNEL_OK")
</pallas_src>

<mosaic_0001>
module attributes {stable_mosaic.version = 11 : i64} {
  func.func @_inner_product_decoder_kernel(%arg0: i32, %arg1: i32, %arg2: memref<128x32xf32, #tpu.memory_space<vmem>>, %arg3: memref<32x256xf32, #tpu.memory_space<vmem>>, %arg4: memref<128x256xf32, #tpu.memory_space<vmem>>) attributes {dimension_semantics = [#tpu.dimension_semantics<parallel>, #tpu.dimension_semantics<parallel>], iteration_bounds = array<i64: 2, 1>, scalar_prefetch = 0 : i64, scratch_operands = 0 : i64, tpu.core_type = #tpu.core_type<tc>, window_params = [{transform_indices = @transform_0, window_bounds = array<i64: 128, 32>}, {transform_indices = @transform_1, window_bounds = array<i64: 32, 256>}, {transform_indices = @transform_2, window_bounds = array<i64: 128, 256>}]} {
    %c0 = arith.constant 0 : index
    %c0_0 = arith.constant 0 : index
    %0 = vector.load %arg2[%c0, %c0_0] : memref<128x32xf32, #tpu.memory_space<vmem>>, vector<128x32xf32>
    %c0_1 = arith.constant 0 : index
    %c0_2 = arith.constant 0 : index
    %1 = vector.load %arg3[%c0_1, %c0_2] : memref<32x256xf32, #tpu.memory_space<vmem>>, vector<32x256xf32>
    %cst = arith.constant dense<0.000000e+00> : vector<128x256xf32>
    %2 = tpu.matmul %0, %1, %cst {dimension_numbers = #tpu.dot_dimension_numbers<[1], [0], [0], [1], [0, 0, 1, 1], [], []>} : vector<128x32xf32>, vector<32x256xf32>, vector<128x256xf32> -> vector<128x256xf32>
    %cst_3 = arith.constant 5.000000e-01 : f32
    %3 = vector.broadcast %cst_3 : f32 to vector<128x256xf32>
    %4 = arith.mulf %3, %2 : vector<128x256xf32>
    %5 = math.tanh %4 : vector<128x256xf32>
    %cst_4 = arith.constant 1.000000e+00 : f32
    %6 = vector.broadcast %cst_4 : f32 to vector<128x256xf32>
    %7 = arith.addf %5, %6 : vector<128x256xf32>
    %cst_5 = arith.constant 5.000000e-01 : f32
    %8 = vector.broadcast %cst_5 : f32 to vector<128x256xf32>
    %9 = arith.mulf %8, %7 : vector<128x256xf32>
    %c0_6 = arith.constant 0 : index
    %c0_7 = arith.constant 0 : index
    %10 = vector.load %arg4[%c0_6, %c0_7] : memref<128x256xf32, #tpu.memory_space<vmem>>, vector<128x256xf32>
    tpu.vector_store %arg4[%c0_6, %c0_7], %9 {strides = array<i32>} : memref<128x256xf32, #tpu.memory_space<vmem>>, vector<128x256xf32>,
    return
  }
  func.func @transform_0(%arg0: i32, %arg1: i32) -> (i32, i32) {
    %c0_i32 = arith.constant 0 : i32
    %c0_i32_0 = arith.constant 0 : i32
    return %arg0, %c0_i32 : i32, i32
  }
  func.func @transform_1(%arg0: i32, %arg1: i32) -> (i32, i32) {
    %c0_i32 = arith.constant 0 : i32
    %c0_i32_0 = arith.constant 0 : i32
    return %c0_i32, %arg1 : i32, i32
  }
  func.func @transform_2(%arg0: i32, %arg1: i32) -> (i32, i32) {
    %c0_i32 = arith.constant 0 : i32
    return %arg0, %arg1 : i32, i32
  }
}

</mosaic_0001>

<bundles_post_ra>
// kernel: tpu_custom_call.1
= control target key start
LH: loop header
LB: loop body
LE: loop exit
PB: predicated region body
PF: predicated region fallthrough
CT: control target
= control target key end

     0   :  { %7 = vsyncpa [#allocation3], 0  ;;  %s1161_s0 = inlined_call_operand.vmem [shape: f32[256,32], index: 0, kind: input, shape index: {}]   ;;  %s1162_s1 = inlined_call_operand.vmem [shape: f32[32,256], index: 1, kind: input, shape index: {}]   ;;  %s1163_s2 = inlined_call_operand.hbm [shape: f32[256,256], index: 2, kind: output, shape index: {}]  }
   0x1   :  { %9 = vsyncpa [#allocation3 + $0x1], 0  ;;  %s947_s9 = smov 0   ;;  %s949_s10 = smov 0  }
   0x2   :  { %s951_s11 = smov 0   ;;  %s953_s12 = smov 0  }
   0x3   :  { %s955_s13 = smov 0   ;;  %s957_s14 = smov 0  }
   0x4 LB: > { %s681_s15 = sadd.s32 4294967295, %s926_s14   ;;  %s682_s16 = sadd.s32 4294967294, %s926_s14   ;;  %s926_s14 = sphi %s957_s14, %s15_s14   ;;  %s922_s13 = sphi %s955_s13, %s1170_s13   ;;  %s918_s12 = sphi %s953_s12, %s1169_s12   ;;  %s914_s11 = sphi %s951_s11, %s1168_s11   ;;  %s910_s10 = sphi %s949_s10, %s1167_s10   ;;  %s906_s9 = sphi %s947_s9, %s1166_s9  }
   0x5   : > { %s27_s17 = sadd.s32 1, %s922_s13  ;;  %s88_s18 = sadd.s32 1, %s914_s11 }
   0x6   : > { %p29_p0 = scmp.ge.s32.totalorder %s27_s17, 2  ;;  %p98_p1 = scmp.ne.s32.totalorder %s914_s11, %s910_s10 }
   0x7   : > { %p99_p2 = scmp.eq.s32.totalorder %s681_s15, 1  ;;  %p104_p3 = scmp.ne.s32.totalorder %s910_s10, %s906_s9 }
   0x8   : > { %s1172_s17 = smov (%p29_p0, %s27_s17), 0  ;;  %p105_p5 = scmp.eq.s32.totalorder %s682_s16, 1 }
   0x9   : > { %p987_p4 = por %p99_p2, %p98_p1  ;;  %s83_s20 = ssub.s32 %s922_s13, %s1172_s17 }
   0xa   : > { %p686_p6 = scmp.ge.s32.totalorder %s926_s14, 1  ;;  %p86_p7 = scmp.eq.s32.totalorder %s83_s20, 0 }
   0xb   : > { %p994_p8 = por %p105_p5, %p104_p3  ;;  %p141_p9 = scmp.lt.s32.totalorder %s926_s14, 3 }
   0xc   : > { %s1000_s22 = scalar_select %p86_p7, %s914_s11, %s88_s18  }
   0xd   : > { %p142_p10 = pnand %p686_p6, %p141_p9 }
   0xe   : > { %v199_v0 = vld [vmem:[%s1162_s1 + $0x8] sm:$0xff] (!%p142_p10)  ;;  %v201_v1 = vld [vmem:[%s1162_s1 + $0x18] sm:$0xff] (!%p142_p10)  ;;  %v198_v2 = vld [vmem:[%s1162_s1] sm:$0xff] (!%p142_p10)  ;;  %s688_s29 = sshll.u32 (!%p142_p10), %s918_s12, 4  ;;  %v928_v7 = vmov (!%p142_p10), 0.0   ;;  %vm206_vm0 = vcmask (!%p142_p10), 261120  }
   0xf   : > { %145 = sbr.rel (%p142_p10) target bundleno = 302 (0x12e), region = 28  ;;  %v714_v3 = vpack.c.bf16 (!%p142_p10), %v201_v1, %v199_v0  ;;  %v200_v4 = vld [vmem:[%s1162_s1 + $0x10] sm:$0xff] (!%p142_p10)  ;;  %v203_v5 = vld [vmem:[%s1162_s1 + $0x28] sm:$0xff] (!%p142_p10)  ;;  %v205_v6 = vld [vmem:[%s1162_s1 + $0x38] sm:$0xff] (!%p142_p10)  ;;  %319 = vmatprep.mubr.f32.mxu0 (!%p142_p10), %v928_v7  ;;  %367 = vmatprep.mubr.f32.mxu1 (!%p142_p10), %v928_v7  ;;  %p169_p11 = scmp.lt.s32.totalorder (!%p142_p10), %s688_s29, 31 }
  0x10   : > { %v716_v8 = vpack.c.bf16 (!%p142_p10), %v200_v4, %v198_v2  ;;  %v718_v9 = vpack.c.bf16 (!%p142_p10), %v205_v6, %v203_v5  ;;  %v202_v10 = vld [vmem:[%s1162_s1 + $0x20] sm:$0xff] (!%p142_p10)  ;;  %v204_v11 = vld [vmem:[%s1162_s1 + $0x30] sm:$0xff] (!%p142_p10)  ;;  %s165_s26 = sand.u32 (!%p142_p10), 1, %s910_s10   ;;  %s929_s7 = smov (!%p142_p10), [#allocation2]  }
  0x11   : > { %715 = vmatprep.subr.bf16.mxu0 (!%p142_p10), %v714_v3  ;;  %722 = vmatprep.subr.bf16.mxu1 (!%p142_p10), %v714_v3  ;;  %v720_v12 = vpack.c.bf16 (!%p142_p10), %v204_v11, %v202_v10  ;;  %s1067_s27 = sshll.u32 (!%p142_p10), %s165_s26, 8  ;;  %s852_s8 = sshll.u32 (!%p142_p10), %s929_s7, 4  ;;  %s853_s8 = int_to_ptr.vmem [resolvable:$false] %s852_s8 }
  0x12   : > { %717 = vmatpush1.bf16.msra.mxu0 (!%p142_p10), %v716_v8  ;;  %724 = vmatpush1.bf16.msra.mxu1 (!%p142_p10), %v716_v8  ;;  %s1070_s28 = scalar_lea.vmem (!%p142_p10), [#allocation2], %s1067_s27  ;;  %s854_s15 = scalar_lea.vmem (!%p142_p10), %s853_s8, 8192 }
  0x13   : > { %719 = vmatprep.subr.bf16.mxu0 (!%p142_p10), %v718_v9  ;;  %723 = vmatprep.subr.bf16.mxu1 (!%p142_p10), %v718_v9  ;;  %s593_s30 = sshll.u32 (!%p142_p10), %s1070_s28, 4  ;;  %s1108_s30 = int_to_ptr.vmem [resolvable:$true] %s593_s30 }
  0x14   : > { %s848_s6 = scalar_lea.vmem (!%p142_p10), %s1108_s30, 4096  ;;  %p855_p1 = scmp.lt.s32.totalorder (!%p142_p10), %s1108_s30, %s853_s8 }
  0x15   : > { %p849_p12 = scmp.ne.s32.totalorder (!%p142_p10), %s1108_s30, %s848_s6  ;;  %p856_p2 = scmp.lt.s32.totalorder (!%p142_p10), %s854_s15, %s848_s6 }
  0x16   : > { %s1174_s29 = smov (!%p169_p11, %s688_s29), 31  ;;  %721 = vmatpush1.bf16.msra.mxu0 %v720_v12  ;;  %725 = vmatpush1.bf16.msra.mxu1 %v720_v12 }
  0x17   : > { %s689_s20 = sshll.u32 %s1174_s29, 3  ;;  %s713_s29 = sshll.u32 %s918_s12, 12 }
  0x18   : > { %s1030_s25 = scalar_lea.vmem %s1161_s0, %s689_s20  ;;  %s1106_s5 = scalar_lea.hbm %s1163_s2, %s713_s29 }
  0x19   : > { %v182_v13 = vld [vmem:[%s1030_s25] sm:$0xff]  ;;  %v183_v15 = vld [vmem:[%s1030_s25 + $0x8] sm:$0xff]  ;;  %v184_v17 = vld [vmem:[%s1030_s25 + $0x10] sm:$0xff]  ;;  %s1115_s12 = scalar_lea.sflag [#allocation3], %s165_s26  ;;  %p850_p13 = pnand %p849_p12, %p987_p4 }
  0x1a   : > { %v190_v14 = vld [vmem:[%s1030_s25 + $0x40] sm:$0xff]  ;;  %690 = vmatmul.mubr.msk.f32.vlgmr.msra.gmra.mrb[0].mxu0 %vm206_vm0, %v182_v13  ;;  %v191_v16 = vld [vmem:[%s1030_s25 + $0x48] sm:$0xff]  ;;  %v192_v18 = vld [vmem:[%s1030_s25 + $0x50] sm:$0xff]  ;;  %p857_p3 = por %p856_p2, %p855_p1 }
  0x1b   : > { %698 = vmatmul.mubr.msk.f32.vlgmr.msra.gmra.mrb[0].mxu1 %vm206_vm0, %v190_v14  ;;  %325 = vmatprep.mubr.f32.mxu0 %v928_v7  ;;  %v185_v19 = vld [vmem:[%s1030_s25 + $0x18] sm:$0xff]  ;;  %v186_v21 = vld [vmem:[%s1030_s25 + $0x20] sm:$0xff]  ;;  %v187_v23 = vld [vmem:[%s1030_s25 + $0x28] sm:$0xff]  ;;  %p851_p0 = pneg %p850_p13 }
  0x1c   : > { %373 = vmatprep.mubr.f32.mxu1 %v928_v7  ;;  %v193_v20 = vld [vmem:[%s1030_s25 + $0x58] sm:$0xff]  ;;  %v194_v22 = vld [vmem:[%s1030_s25 + $0x60] sm:$0xff]  ;;  %v195_v24 = vld [vmem:[%s1030_s25 + $0x68] sm:$0xff] }
  0x1d   : > { %v188_v25 = vld [vmem:[%s1030_s25 + $0x30] sm:$0xff]  ;;  %v189_v27 = vld [vmem:[%s1030_s25 + $0x38] sm:$0xff]  ;;  %p858_p5 = pnand %p857_p3, %p851_p0 }
  0x1e   : > { %691 = vmatmul.mubr.msk.f32.gmra.mrb[2].mxu0 %vm206_vm0, %v183_v15  ;;  %v196_v26 = vld [vmem:[%s1030_s25 + $0x70] sm:$0xff]  ;;  %v197_v28 = vld [vmem:[%s1030_s25 + $0x78] sm:$0xff] }
  0x1f   : > { %699 = vmatmul.mubr.msk.f32.gmra.mrb[2].mxu1 %vm206_vm0, %v191_v16  ;;  %331 = vmatprep.mubr.f32.mxu0 %v928_v7 }
  0x20   : > { %379 = vmatprep.mubr.f32.mxu1 %v928_v7 }
  0x22   : > { %692 = vmatmul.mubr.msk.f32.gmra.mrb[4].mxu0 %vm206_vm0, %v184_v17 }
  0x23   : > { %700 = vmatmul.mubr.msk.f32.gmra.mrb[4].mxu1 %vm206_vm0, %v192_v18  ;;  %337 = vmatprep.mubr.f32.mxu0 %v928_v7 }
  0x24   : > { %385 = vmatprep.mubr.f32.mxu1 %v928_v7 }
  0x26   : > { %693 = vmatmul.mubr.msk.f32.gmra.mrb[6].mxu0 %vm206_vm0, %v185_v19 }
  0x27   : > { %701 = vmatmul.mubr.msk.f32.gmra.mrb[6].mxu1 %vm206_vm0, %v193_v20  ;;  %343 = vmatprep.mubr.f32.mxu0 %v928_v7 }
  0x28   : > { %391 = vmatprep.mubr.f32.mxu1 %v928_v7 }
  0x2a   : > { %694 = vmatmul.mubr.msk.f32.gmra.mrb[8].mxu0 %vm206_vm0, %v186_v21 }
  0x2b   : > { %702 = vmatmul.mubr.msk.f32.gmra.mrb[8].mxu1 %vm206_vm0, %v194_v22  ;;  %349 = vmatprep.mubr.f32.mxu0 %v928_v7 }
  0x2c   : > { %397 = vmatprep.mubr.f32.mxu1 %v928_v7 }
  0x2e   : > { %695 = vmatmul.mubr.msk.f32.gmra.mrb[10].mxu0 %vm206_vm0, %v187_v23 }
  0x2f   : > { %703 = vmatmul.mubr.msk.f32.gmra.mrb[10].mxu1 %vm206_vm0, %v195_v24  ;;  %355 = vmatprep.mubr.f32.mxu0 %v928_v7 }
  0x30   : > { %403 = vmatprep.mubr.f32.mxu1 %v928_v7 }
  0x32   : > { %696 = vmatmul.mubr.msk.f32.gmra.mrb[12].mxu0 %vm206_vm0, %v188_v25 }
  0x33   : > { %704 = vmatmul.mubr.msk.f32.gmra.mrb[12].mxu1 %vm206_vm0, %v196_v26  ;;  %361 = vmatprep.mubr.f32.mxu0 %v928_v7 }
  0x34   : > { %409 = vmatprep.mubr.f32.mxu1 %v928_v7 }
  0x36   : > { %697 = vmatmul.mubr.msk.f32.gmra.mrb[14].mxu0 %vm206_vm0, %v189_v27 }
  0x37   : > { %705 = vmatmul.mubr.msk.f32.gmra.mrb[14].mxu1 %vm206_vm0, %v197_v28 }
  0xed   : > { %v321_v29 = vpop.f32.mrb[0].mxu0 }
  0xee   : > { %v369_v30 = vpop.f32.mrb[0].mxu1  ;;  %v416_v31 = vmul.f32 0.5, %v321_v29  ;;  %v323_v33 = vpop.f32.mrb[1].mxu0 }
  0xef   : > { %v432_v32 = vmul.f32 0.5, %v369_v30  ;;  %v371_v34 = vpop.f32.mrb[1].mxu1  ;;  %v417_v35 = vmul.f32 0.5, %v323_v33 }
  0xf0   : > { %v433_v36 = vmul.f32 0.5, %v371_v34  ;;  %784 = vtanh.f32 %v416_v31 }
  0xf1   : > { %786 = vtanh.f32 %v432_v32  ;;  %v327_v37 = vpop.f32.mrb[2].mxu0 }
  0xf2   : > { %v375_v38 = vpop.f32.mrb[2].mxu1  ;;  %788 = vtanh.f32 %v417_v35  ;;  %v418_v39 = vmul.f32 0.5, %v327_v37  ;;  %v329_v41 = vpop.f32.mrb[3].mxu0 }
  0xf3   : > { %v434_v40 = vmul.f32 0.5, %v375_v38  ;;  %v377_v42 = vpop.f32.mrb[3].mxu1  ;;  %790 = vtanh.f32 %v433_v36  ;;  %v419_v43 = vmul.f32 0.5, %v329_v41 }
  0xf4   : > { %v435_v44 = vmul.f32 0.5, %v377_v42  ;;  %792 = vtanh.f32 %v418_v39 }
  0xf5   : > { %794 = vtanh.f32 %v434_v40  ;;  %v333_v45 = vpop.f32.mrb[4].mxu0 }
  0xf6   : > { %v381_v46 = vpop.f32.mrb[4].mxu1  ;;  %796 = vtanh.f32 %v419_v43  ;;  %v420_v47 = vmul.f32 0.5, %v333_v45  ;;  %v335_v49 = vpop.f32.mrb[5].mxu0 }
  0xf7   : > { %v436_v48 = vmul.f32 0.5, %v381_v46  ;;  %v383_v50 = vpop.f32.mrb[5].mxu1  ;;  %798 = vtanh.f32 %v435_v44  ;;  %v421_v51 = vmul.f32 0.5, %v335_v49 }
  0xf8   : > { %v437_v52 = vmul.f32 0.5, %v383_v50  ;;  %800 = vtanh.f32 %v420_v47 }
  0xf9   : > { %802 = vtanh.f32 %v436_v48  ;;  %v339_v53 = vpop.f32.mrb[6].mxu0 }
  0xfa   : > { %v387_v54 = vpop.f32.mrb[6].mxu1  ;;  %v785_v55 = vpop.eup %784  ;;  %804 = vtanh.f32 %v421_v51  ;;  %v422_v56 = vmul.f32 0.5, %v339_v53 }
  0xfb   : > { %v438_v57 = vmul.f32 0.5, %v387_v54  ;;  %v341_v58 = vpop.f32.mrb[7].mxu0  ;;  %v389_v59 = vpop.f32.mrb[7].mxu1  ;;  %v480_v61 = vadd.f32 1.0, %v785_v55  ;;  %806 = vtanh.f32 %v437_v52 }
  0xfc   : > { %v787_v60 = vpop.eup %786  ;;  %v423_v62 = vmul.f32 0.5, %v341_v58  ;;  %v439_v63 = vmul.f32 0.5, %v389_v59  ;;  %808 = vtanh.f32 %v422_v56 }
  0xfd   : > { %v789_v0 = vpop.eup %788  ;;  %v496_v1 = vadd.f32 1.0, %v787_v60  ;;  %v512_v3 = vmul.f32 0.5, %v480_v61  ;;  %810 = vtanh.f32 %v438_v57  ;;  %v345_v5 = vpop.f32.mrb[8].mxu0 }
  0xfe   : > { %v791_v2 = vpop.eup %790  ;;  %v481_v4 = vadd.f32 1.0, %v789_v0  ;;  %v393_v6 = vpop.f32.mrb[8].mxu1  ;;  %812 = vtanh.f32 %v423_v62  ;;  %v424_v10 = vmul.f32 0.5, %v345_v5 }
  0xff   : > { %v793_v7 = vpop.eup %792  ;;  %v528_v8 = vmul.f32 0.5, %v496_v1  ;;  %v497_v9 = vadd.f32 1.0, %v791_v2  ;;  %v347_v11 = vpop.f32.mrb[9].mxu0  ;;  %544 = vst [vmem:[%s1070_s28] sm:$0xff] %v512_v3  ;;  %814 = vtanh.f32 %v439_v63  ;;  %v440_v16 = vmul.f32 0.5, %v393_v6 }
 0x100   : > { %v395_v12 = vpop.f32.mrb[9].mxu1  ;;  %v795_v13 = vpop.eup %794  ;;  %v513_v14 = vmul.f32 0.5, %v481_v4  ;;  %v482_v15 = vadd.f32 1.0, %v793_v7  ;;  %816 = vtanh.f32 %v424_v10  ;;  %v425_v20 = vmul.f32 0.5, %v347_v11 }
 0x101   : > { %v797_v17 = vpop.eup %796  ;;  %560 = vst [vmem:[%s1070_s28 + $0x80] sm:$0xff] %v528_v8  ;;  %v529_v18 = vmul.f32 0.5, %v497_v9  ;;  %v498_v19 = vadd.f32 1.0, %v795_v13  ;;  %818 = vtanh.f32 %v440_v16  ;;  %v441_v24 = vmul.f32 0.5, %v395_v12  ;;  %v351_v25 = vpop.f32.mrb[10].mxu0 }
 0x102   : > { %v799_v21 = vpop.eup %798  ;;  %545 = vst [vmem:[%s1070_s28 + $0x8] sm:$0xff] %v513_v14  ;;  %v514_v22 = vmul.f32 0.5, %v482_v15  ;;  %v483_v23 = vadd.f32 1.0, %v797_v17  ;;  %v399_v26 = vpop.f32.mrb[10].mxu1  ;;  %820 = vtanh.f32 %v425_v20  ;;  %v426_v30 = vmul.f32 0.5, %v351_v25 }
 0x103   : > { %v801_v27 = vpop.eup %800  ;;  %561 = vst [vmem:[%s1070_s28 + $0x88] sm:$0xff] %v529_v18  ;;  %v530_v28 = vmul.f32 0.5, %v498_v19  ;;  %v499_v29 = vadd.f32 1.0, %v799_v21  ;;  %v353_v31 = vpop.f32.mrb[11].mxu0  ;;  %822 = vtanh.f32 %v441_v24  ;;  %v442_v36 = vmul.f32 0.5, %v399_v26 }
 0x104   : > { %v401_v32 = vpop.f32.mrb[11].mxu1  ;;  %v803_v33 = vpop.eup %802  ;;  %546 = vst [vmem:[%s1070_s28 + $0x10] sm:$0xff] %v514_v22  ;;  %v515_v34 = vmul.f32 0.5, %v483_v23  ;;  %v484_v35 = vadd.f32 1.0, %v801_v27  ;;  %824 = vtanh.f32 %v426_v30  ;;  %v427_v40 = vmul.f32 0.5, %v353_v31 }
 0x105   : > { %v805_v37 = vpop.eup %804  ;;  %562 = vst [vmem:[%s1070_s28 + $0x90] sm:$0xff] %v530_v28  ;;  %v531_v38 = vmul.f32 0.5, %v499_v29  ;;  %v500_v39 = vadd.f32 1.0, %v803_v33  ;;  %826 = vtanh.f32 %v442_v36  ;;  %v443_v44 = vmul.f32 0.5, %v401_v32  ;;  %v357_v45 = vpop.f32.mrb[12].mxu0 }
 0x106   : > { %v807_v41 = vpop.eup %806  ;;  %547 = vst [vmem:[%s1070_s28 + $0x18] sm:$0xff] %v515_v34  ;;  %v516_v42 = vmul.f32 0.5, %v484_v35  ;;  %v485_v43 = vadd.f32 1.0, %v805_v37  ;;  %v405_v46 = vpop.f32.mrb[12].mxu1  ;;  %828 = vtanh.f32 %v427_v40  ;;  %v428_v50 = vmul.f32 0.5, %v357_v45 }
 0x107   : > { %v809_v47 = vpop.eup %808  ;;  %563 = vst [vmem:[%s1070_s28 + $0x98] sm:$0xff] %v531_v38  ;;  %v532_v48 = vmul.f32 0.5, %v500_v39  ;;  %v501_v49 = vadd.f32 1.0, %v807_v41  ;;  %v359_v51 = vpop.f32.mrb[13].mxu0  ;;  %830 = vtanh.f32 %v443_v44  ;;  %v444_v56 = vmul.f32 0.5, %v405_v46 }
 0x108   : > { %v407_v52 = vpop.f32.mrb[13].mxu1  ;;  %v811_v53 = vpop.eup %810  ;;  %548 = vst [vmem:[%s1070_s28 + $0x20] sm:$0xff] %v516_v42  ;;  %v517_v54 = vmul.f32 0.5, %v485_v43  ;;  %v486_v55 = vadd.f32 1.0, %v809_v47  ;;  %832 = vtanh.f32 %v428_v50  ;;  %v429_v60 = vmul.f32 0.5, %v359_v51 }
 0x109   : > { %v813_v57 = vpop.eup %812  ;;  %564 = vst [vmem:[%s1070_s28 + $0xa0] sm:$0xff] %v532_v48  ;;  %v533_v58 = vmul.f32 0.5, %v501_v49  ;;  %v502_v59 = vadd.f32 1.0, %v811_v53  ;;  %834 = vtanh.f32 %v444_v56  ;;  %v445_v0 = vmul.f32 0.5, %v407_v52  ;;  %v363_v1 = vpop.f32.mrb[14].mxu0 }
 0x10a   : > { %v815_v61 = vpop.eup %814  ;;  %549 = vst [vmem:[%s1070_s28 + $0x28] sm:$0xff] %v517_v54  ;;  %v518_v62 = vmul.f32 0.5, %v486_v55  ;;  %v487_v63 = vadd.f32 1.0, %v813_v57  ;;  %v411_v2 = vpop.f32.mrb[14].mxu1  ;;  %836 = vtanh.f32 %v429_v60  ;;  %v430_v6 = vmul.f32 0.5, %v363_v1 }
 0x10b   : > { %v817_v3 = vpop.eup %816  ;;  %565 = vst [vmem:[%s1070_s28 + $0xa8] sm:$0xff] %v533_v58  ;;  %v534_v4 = vmul.f32 0.5, %v502_v59  ;;  %v503_v5 = vadd.f32 1.0, %v815_v61  ;;  %v365_v7 = vpop.f32.mrb[15].mxu0  ;;  %838 = vtanh.f32 %v445_v0  ;;  %v446_v12 = vmul.f32 0.5, %v411_v2 }
 0x10c   : > { %v413_v8 = vpop.f32.mrb[15].mxu1  ;;  %v819_v9 = vpop.eup %818  ;;  %550 = vst [vmem:[%s1070_s28 + $0x30] sm:$0xff] %v518_v62  ;;  %v519_v10 = vmul.f32 0.5, %v487_v63  ;;  %v488_v11 = vadd.f32 1.0, %v817_v3  ;;  %840 = vtanh.f32 %v430_v6  ;;  %v431_v16 = vmul.f32 0.5, %v365_v7 }
 0x10d   : > { %v821_v13 = vpop.eup %820  ;;  %566 = vst [vmem:[%s1070_s28 + $0xb0] sm:$0xff] %v534_v4  ;;  %v535_v14 = vmul.f32 0.5, %v503_v5  ;;  %v504_v15 = vadd.f32 1.0, %v819_v9  ;;  %842 = vtanh.f32 %v446_v12  ;;  %v447_v20 = vmul.f32 0.5, %v413_v8 }
 0x10e   : > { %v823_v17 = vpop.eup %822  ;;  %551 = vst [vmem:[%s1070_s28 + $0x38] sm:$0xff] %v519_v10  ;;  %v520_v18 = vmul.f32 0.5, %v488_v11  ;;  %v489_v19 = vadd.f32 1.0, %v821_v13  ;;  %844 = vtanh.f32 %v431_v16 }
 0x10f   : > { %v825_v21 = vpop.eup %824  ;;  %567 = vst [vmem:[%s1070_s28 + $0xb8] sm:$0xff] %v535_v14  ;;  %v536_v22 = vmul.f32 0.5, %v504_v15  ;;  %v505_v23 = vadd.f32 1.0, %v823_v17  ;;  %846 = vtanh.f32 %v447_v20 }
 0x110   : > { %v827_v24 = vpop.eup %826  ;;  %552 = vst [vmem:[%s1070_s28 + $0x40] sm:$0xff] %v520_v18  ;;  %v521_v25 = vmul.f32 0.5, %v489_v19  ;;  %v490_v26 = vadd.f32 1.0, %v825_v21 }
 0x111   : > { %v829_v27 = vpop.eup %828  ;;  %568 = vst [vmem:[%s1070_s28 + $0xc0] sm:$0xff] %v536_v22  ;;  %v537_v28 = vmul.f32 0.5, %v505_v23  ;;  %v506_v29 = vadd.f32 1.0, %v827_v24 }
 0x112   : > { %v831_v30 = vpop.eup %830  ;;  %553 = vst [vmem:[%s1070_s28 + $0x48] sm:$0xff] %v521_v25  ;;  %v522_v31 = vmul.f32 0.5, %v490_v26  ;;  %v491_v32 = vadd.f32 1.0, %v829_v27 }
 0x113   : > { %v833_v33 = vpop.eup %832  ;;  %569 = vst [vmem:[%s1070_s28 + $0xc8] sm:$0xff] %v537_v28  ;;  %v538_v34 = vmul.f32 0.5, %v506_v29  ;;  %v507_v35 = vadd.f32 1.0, %v831_v30 }
 0x114   : > { %v835_v36 = vpop.eup %834  ;;  %554 = vst [vmem:[%s1070_s28 + $0x50] sm:$0xff] %v522_v31  ;;  %v523_v37 = vmul.f32 0.5, %v491_v32  ;;  %v492_v38 = vadd.f32 1.0, %v833_v33 }
 0x115   : > { %v837_v39 = vpop.eup %836  ;;  %570 = vst [vmem:[%s1070_s28 + $0xd0] sm:$0xff] %v538_v34  ;;  %v539_v40 = vmul.f32 0.5, %v507_v35  ;;  %v508_v41 = vadd.f32 1.0, %v835_v36 }
 0x116   : > { %v839_v42 = vpop.eup %838  ;;  %555 = vst [vmem:[%s1070_s28 + $0x58] sm:$0xff] %v523_v37  ;;  %v524_v43 = vmul.f32 0.5, %v492_v38  ;;  %v493_v44 = vadd.f32 1.0, %v837_v39 }
 0x117   : > { %v841_v45 = vpop.eup %840  ;;  %571 = vst [vmem:[%s1070_s28 + $0xd8] sm:$0xff] %v539_v40  ;;  %v540_v46 = vmul.f32 0.5, %v508_v41  ;;  %v509_v47 = vadd.f32 1.0, %v839_v42 }
 0x118   : > { %v843_v48 = vpop.eup %842  ;;  %556 = vst [vmem:[%s1070_s28 + $0x60] sm:$0xff] %v524_v43  ;;  %v525_v49 = vmul.f32 0.5, %v493_v44  ;;  %v494_v50 = vadd.f32 1.0, %v841_v45 }
 0x119   : > { %v845_v51 = vpop.eup %844  ;;  %572 = vst [vmem:[%s1070_s28 + $0xe0] sm:$0xff] %v540_v46  ;;  %v541_v52 = vmul.f32 0.5, %v509_v47  ;;  %v510_v53 = vadd.f32 1.0, %v843_v48 }
 0x11a   : > { %v847_v54 = vpop.eup %846  ;;  %557 = vst [vmem:[%s1070_s28 + $0x68] sm:$0xff] %v525_v49  ;;  %v526_v55 = vmul.f32 0.5, %v494_v50  ;;  %v495_v56 = vadd.f32 1.0, %v845_v51 }
 0x11b   : > { %573 = vst [vmem:[%s1070_s28 + $0xe8] sm:$0xff] %v541_v52  ;;  %v542_v57 = vmul.f32 0.5, %v510_v53  ;;  %v511_v58 = vadd.f32 1.0, %v847_v54 }
 0x11c   : > { %558 = vst [vmem:[%s1070_s28 + $0x70] sm:$0xff] %v526_v55  ;;  %v527_v59 = vmul.f32 0.5, %v495_v56 }
 0x11d   : > { %574 = vst [vmem:[%s1070_s28 + $0xf0] sm:$0xff] %v542_v57  ;;  %v543_v60 = vmul.f32 0.5, %v511_v58 }
 0x11e   : > { %559 = vst [vmem:[%s1070_s28 + $0x78] sm:$0xff] %v527_v59 }
 0x11f   : > { %575 = vst [vmem:[%s1070_s28 + $0xf8] sm:$0xff] %v543_v60 }
 0x120   : > { %861 = shalt.err (!%p858_p5)
}
 0x121   : > { %s862_s16 = scalar_lea.hbm %s1106_s5, 4096  ;;  %s866_s23 = scalar_lea.hbm %s1163_s2, 8192 }
 0x122   : > { %p863_p6 = scmp.ne.s32.totalorder %s1106_s5, %s862_s16  ;;  %p867_p10 = scmp.lt.u32.totalorder %s1106_s5, %s1163_s2 }
 0x123   : > { %p868_p11 = scmp.lt.u32.totalorder %s866_s23, %s862_s16  ;;  %p870_p13 = scmp.lt.u32.totalorder %s862_s16, %s1106_s5 }
 0x124   : > { %p864_p7 = pnand %p863_p6, %p987_p4 }
 0x125   : > { %p869_p12 = por %p868_p11, %p867_p10 }
 0x126   : > { %p865_p9 = pneg %p864_p7 }
 0x127   : > { %p871_p0 = por %p870_p13, %p869_p12 }
 0x129   : > { %p872_p1 = pnand %p871_p0, %p865_p9 }
 0x12b   : > { %875 = shalt.err (!%p872_p1)
}
 0x12c   : > { %s930_s26 = smov 256   ;;  %s931_s27 = smov 16  }
 0x12d   : > { %726 = dma.vmem_to_hbm [thread:$0]  (%p987_p4), %s1108_s30, 4096, %s1106_s5, %s1115_s12, %s930_s26, %s930_s26, %s931_s27  }
 0x12e PF: > { %p732_p2 = scmp.ge.s32.totalorder %s926_s14, 2  ;;  %s608_s28 = sand.u32 1, %s906_s9  }
 0x12f   : > { %s609_s29 = scalar_lea.sflag [#allocation3], %s608_s28 }
 0x130   : > { %p729_p3 = pnand %p732_p2, %p994_p8 }
 0x132   : > { %901 = dma.done.wait (!%p729_p3), %s609_s29, 4096  }
 0x133   : > { %903 = vsyncadd (!%p729_p3), %s609_s29, 4294963200  ;;  %s15_s14 = sadd.s32 1, %s926_s14   ;;  %s1166_s9 = smov %s910_s10 }
 0x134   : > { %p12_p5 = scmp.ge.s32.totalorder %s15_s14, 4   ;;  %s1167_s10 = smov %s914_s11 }
 0x135   : > { %s1168_s11 = smov %s1000_s22  ;;  %s1169_s12 = smov %s922_s13 }
 0x136   : > { %s1170_s13 = smov %s1172_s17  ;;  %14 = sbr.rel (!%p12_p5) target bundleno = 4 (0x4), region = 66 }
 0x13d   :  { %614 = vsyncpa [#allocation3], 1 }
 0x13e   :  { %616 = vsyncpa [#allocation3 + $0x1], 1 }

</bundles_post_ra>
